<compile_context>
chip_gen: v7x
topology: tpu7x:2x2x1
jax: 0.10.0
libtpu: 0.0.40
codegen_flags: <defaults>
</compile_context>

<pallas_src>
import functools
import math

import jax
import jax.numpy as jnp
from jax.experimental import pallas as pl
from jax.experimental.pallas import tpu as pltpu


def _ffn_kernel_single(x_ref, w1_ref, b1_ref, w2_ref, b2_ref, o_ref):
    """Whole FFN for one row tile when d_ff fits a single chunk."""
    # fc1: (tm, d_model) @ (d_model, d_ff) -> (tm, d_ff), f32 acc on the MXU.
    h = jnp.dot(x_ref[...], w1_ref[...], preferred_element_type=jnp.float32)
    h = h + b1_ref[...].astype(jnp.float32)            # broadcast (1, d_ff)
    h = h * jax.nn.sigmoid(h)                          # SiLU (sigmoid -> EUP)
    # fc2: (tm, d_ff) @ (d_ff, d_model) -> (tm, d_model).
    y = jnp.dot(h.astype(w2_ref.dtype), w2_ref[...],
                preferred_element_type=jnp.float32)
    o_ref[...] = (y + b2_ref[...].astype(jnp.float32)).astype(o_ref.dtype)


def _ffn_kernel_acc(x_ref, w1_ref, b1_ref, w2_ref, b2_ref, o_ref, acc_ref):
    """One (row-tile i, d_ff-tile k) step with a persistent f32 accumulator."""
    k = pl.program_id(1)

    @pl.when(k == 0)
    def _init():
        acc_ref[...] = jnp.zeros_like(acc_ref)

    # fc1 chunk: (tm, d_model) @ (d_model, tf) -> (tm, tf).
    h = jnp.dot(x_ref[...], w1_ref[...], preferred_element_type=jnp.float32)
    h = h + b1_ref[...].astype(jnp.float32)            # broadcast (1, tf)
    h = h * jax.nn.sigmoid(h)                          # SiLU

    # Partial fc2: (tm, tf) @ (tf, d_model), accumulated in f32 scratch.
    acc_ref[...] += jnp.dot(h.astype(w2_ref.dtype), w2_ref[...],
                            preferred_element_type=jnp.float32)

    @pl.when(k == pl.num_programs(1) - 1)
    def _finalize():
        o_ref[...] = (acc_ref[...]
                      + b2_ref[...].astype(jnp.float32)).astype(o_ref.dtype)


def _round_up(n, m):
    return ((n + m - 1) // m) * m


@functools.partial(jax.jit, static_argnames=("tm", "tf"))
def position_wise_feed_forward(x, w1, b1, w2, b2, *, tm=256, tf=512):
    """x: (..., d_model). Returns same shape/dtype as x."""
    *lead, d_model = x.shape
    d_ff = w1.shape[1]
    m = math.prod(lead) if lead else 1

    # Row tile: big enough to feed the MXU / amortize per-step overhead and
    # weight re-streaming, shrunk (8-aligned) for tiny inputs to avoid padding.
    tm_eff = min(tm, _round_up(m, 8))
    m_pad = _round_up(m, tm_eff)

    # d_ff tile: use full d_ff when it already fits the budget, otherwise a
    # 128-aligned chunk accumulated over a second (reduction) grid axis.
    if d_ff <= tf:
        tf_eff = d_ff
        f_pad = d_ff
    else:
        assert tf % 128 == 0, "tf must be a multiple of 128 when d_ff > tf"
        tf_eff = tf
        f_pad = _round_up(d_ff, tf_eff)
    grid_k = f_pad // tf_eff

    x2d = x.reshape(m, d_model)
    if m_pad != m:
        x2d = jnp.pad(x2d, ((0, m_pad - m), (0, 0)))

    w1p, b1p, w2p = w1, b1, w2
    if f_pad != d_ff:
        # Zero-padded hidden columns: SiLU(0 + 0) = 0 contributes nothing to fc2.
        w1p = jnp.pad(w1, ((0, 0), (0, f_pad - d_ff)))
        b1p = jnp.pad(b1, ((0, f_pad - d_ff),))
        w2p = jnp.pad(w2, ((0, f_pad - d_ff), (0, 0)))
    b1_2d = b1p.reshape(1, f_pad)
    b2_2d = b2.reshape(1, d_model)

    # VMEM budget for this tiling (double-buffered pipelined blocks + scratch).
    xb = x.dtype.itemsize
    wb = w1.dtype.itemsize
    est = (2 * tm_eff * d_model * xb          # x blocks
           + 2 * d_model * tf_eff * wb        # w1 blocks
           + 2 * tf_eff * wb                  # b1 blocks
           + 2 * tf_eff * d_model * wb        # w2 blocks
           + 2 * d_model * wb                 # b2 blocks
           + 2 * tm_eff * d_model * xb        # out blocks
           + tm_eff * tf_eff * 4              # f32 fc1/SiLU intermediate
           + (tm_eff * d_model * 4 if grid_k > 1 else 0))   # acc scratch
    vmem_limit = max(32 * 1024 * 1024, min(128 * 1024 * 1024, int(1.25 * est)))

    cost = pl.CostEstimate(
        flops=4 * m * d_model * d_ff,         # two matmuls, 2 flops/MAC
        transcendentals=m * d_ff,             # sigmoid inside SiLU
        bytes_accessed=(2 * m * d_model * xb              # read x, write out
                        + 2 * d_model * d_ff * wb         # W1, W2
                        + (d_ff + d_model) * wb),         # biases
    )

    if grid_k == 1:
        # ---- Fast path: whole d_ff in one chunk, no accumulator scratch. ----
        grid_spec = pltpu.PrefetchScalarGridSpec(
            num_scalar_prefetch=0,
            grid=(m_pad // tm_eff,),
            in_specs=[
                pl.BlockSpec((tm_eff, d_model), lambda i: (i, 0)),      # x rows
                pl.BlockSpec((d_model, tf_eff), lambda i: (0, 0)),      # W1
                pl.BlockSpec((1, tf_eff), lambda i: (0, 0)),            # b1
                pl.BlockSpec((tf_eff, d_model), lambda i: (0, 0)),      # W2
                pl.BlockSpec((1, d_model), lambda i: (0, 0)),           # b2
            ],
            out_specs=pl.BlockSpec((tm_eff, d_model), lambda i: (i, 0)),
            scratch_shapes=[],
        )
        kernel = _ffn_kernel_single
        dim_sem = ("parallel",)
    else:
        # ---- Reduction path: tile d_ff, accumulate fc2 partials in f32. ----
        grid_spec = pltpu.PrefetchScalarGridSpec(
            num_scalar_prefetch=0,
            grid=(m_pad // tm_eff, grid_k),
            in_specs=[
                pl.BlockSpec((tm_eff, d_model), lambda i, k: (i, 0)),   # x rows
                pl.BlockSpec((d_model, tf_eff), lambda i, k: (0, k)),   # W1 chunk
                pl.BlockSpec((1, tf_eff), lambda i, k: (0, k)),         # b1 chunk
                pl.BlockSpec((tf_eff, d_model), lambda i, k: (k, 0)),   # W2 chunk
                pl.BlockSpec((1, d_model), lambda i, k: (0, 0)),        # b2
            ],
            out_specs=pl.BlockSpec((tm_eff, d_model), lambda i, k: (i, 0)),
            scratch_shapes=[pltpu.VMEM((tm_eff, d_model), jnp.float32)],
        )
        kernel = _ffn_kernel_acc
        dim_sem = ("parallel", "arbitrary")

    out2d = pl.pallas_call(
        kernel,
        out_shape=jax.ShapeDtypeStruct((m_pad, d_model), x.dtype),
        grid_spec=grid_spec,
        compiler_params=pltpu.CompilerParams(
            dimension_semantics=dim_sem,
            vmem_limit_bytes=vmem_limit,
        ),
        cost_estimate=cost,
    )(x2d, w1p, b1_2d, w2p, b2_2d)

    out = out2d[:m] if m_pad != m else out2d
    return out.reshape(*lead, d_model)


def init_params(key, d_model, d_ff, dtype=jnp.float32):
    """Deterministic init matching torch.nn.Linear's default uniform scheme
    (U(-1/sqrt(fan_in), 1/sqrt(fan_in))). Weights stored as (in, out)."""
    k1, k2, k3, k4 = jax.random.split(key, 4)
    bound1 = 1.0 / (d_model ** 0.5)
    bound2 = 1.0 / (d_ff ** 0.5)
    w1 = jax.random.uniform(k1, (d_model, d_ff), jnp.float32, -bound1, bound1)
    b1 = jax.random.uniform(k2, (d_ff,), jnp.float32, -bound1, bound1)
    w2 = jax.random.uniform(k3, (d_ff, d_model), jnp.float32, -bound2, bound2)
    b2 = jax.random.uniform(k4, (d_model,), jnp.float32, -bound2, bound2)
    return (w1.astype(dtype), b1.astype(dtype),
            w2.astype(dtype), b2.astype(dtype))


def _reference(x, w1, b1, w2, b2):
    x, w1, b1, w2, b2 = (a.astype(jnp.float32) for a in (x, w1, b1, w2, b2))
    h = jnp.dot(x, w1) + b1
    h = h * jax.nn.sigmoid(h)
    return jnp.dot(h, w2) + b2


if __name__ == "__main__":
    # --- Config 1: small f32, fast path (single chunk, 1-D grid). -----------
    batch, seq, d_model, d_ff = 2, 8, 32, 64
    key = jax.random.PRNGKey(0)
    kx, kp = jax.random.split(key)
    x = jax.random.normal(kx, (batch, seq, d_model), jnp.float32)
    w1, b1, w2, b2 = init_params(kp, d_model, d_ff)

    out = jax.block_until_ready(position_wise_feed_forward(x, w1, b1, w2, b2))
    ref = _reference(x, w1, b1, w2, b2)
    assert out.shape == x.shape and out.dtype == x.dtype
    assert jnp.allclose(out, ref, atol=1e-5, rtol=1e-5), "f32 mismatch"

    # --- Config 2: row padding + multi-step d_ff reduction (accumulator). ---
    batch2, seq2, d_model2, d_ff2 = 2, 5, 32, 320
    kx2, kp2 = jax.random.split(jax.random.PRNGKey(0))
    x2 = jax.random.normal(kx2, (batch2, seq2, d_model2), jnp.float32)
    p2 = init_params(kp2, d_model2, d_ff2)
    out2 = jax.block_until_ready(
        position_wise_feed_forward(x2, *p2, tm=128, tf=128))
    ref2 = _reference(x2, *p2)
    assert out2.shape == x2.shape
    assert jnp.allclose(out2, ref2, atol=1e-4, rtol=1e-4), "tiled-d_ff mismatch"

    # --- Config 3: bf16 weights/activations (v6e/v7x MXU path). -------------
    xb = x.astype(jnp.bfloat16)
    pb = tuple(p.astype(jnp.bfloat16) for p in (w1, b1, w2, b2))
    outb = jax.block_until_ready(position_wise_feed_forward(xb, *pb))
    refb = _reference(xb, *pb)
    assert outb.dtype == jnp.bfloat16
    assert jnp.allclose(outb.astype(jnp.float32), refb, atol=1e-1, rtol=1e-1), \
        "bf16 mismatch"

    print("KERNEL_OK")
</pallas_src>

<mosaic_0001>
module attributes {stable_mosaic.version = 11 : i64} {
  func.func @_ffn_kernel_single(%arg0: i32, %arg1: memref<16x32xf32, #tpu.memory_space<vmem>>, %arg2: memref<32x64xf32, #tpu.memory_space<vmem>>, %arg3: memref<1x64xf32, #tpu.memory_space<vmem>>, %arg4: memref<64x32xf32, #tpu.memory_space<vmem>>, %arg5: memref<1x32xf32, #tpu.memory_space<vmem>>, %arg6: memref<16x32xf32, #tpu.memory_space<vmem>>) attributes {dimension_semantics = [#tpu.dimension_semantics<parallel>], iteration_bounds = array<i64: 1>, scalar_prefetch = 0 : i64, scratch_operands = 0 : i64, tpu.core_type = #tpu.core_type<tc>, window_params = [{transform_indices = @transform_0, window_bounds = array<i64: 16, 32>}, {pipeline_mode = #tpu.pipeline_mode<synchronous>, transform_indices = @transform_1, window_bounds = array<i64: 32, 64>}, {pipeline_mode = #tpu.pipeline_mode<synchronous>, transform_indices = @transform_2, window_bounds = array<i64: 1, 64>}, {pipeline_mode = #tpu.pipeline_mode<synchronous>, transform_indices = @transform_3, window_bounds = array<i64: 64, 32>}, {pipeline_mode = #tpu.pipeline_mode<synchronous>, transform_indices = @transform_4, window_bounds = array<i64: 1, 32>}, {transform_indices = @transform_5, window_bounds = array<i64: 16, 32>}]} {
    %c0 = arith.constant 0 : index
    %c0_0 = arith.constant 0 : index
    %0 = vector.load %arg1[%c0, %c0_0] : memref<16x32xf32, #tpu.memory_space<vmem>>, vector<16x32xf32>
    %c0_1 = arith.constant 0 : index
    %c0_2 = arith.constant 0 : index
    %1 = vector.load %arg2[%c0_1, %c0_2] : memref<32x64xf32, #tpu.memory_space<vmem>>, vector<32x64xf32>
    %cst = arith.constant dense<0.000000e+00> : vector<16x64xf32>
    %2 = tpu.matmul %0, %1, %cst {dimension_numbers = #tpu.dot_dimension_numbers<[1], [0], [0], [1], [0, 0, 1, 1], [], []>} : vector<16x32xf32>, vector<32x64xf32>, vector<16x64xf32> -> vector<16x64xf32>
    %c0_3 = arith.constant 0 : index
    %c0_4 = arith.constant 0 : index
    %3 = vector.load %arg3[%c0_3, %c0_4] : memref<1x64xf32, #tpu.memory_space<vmem>>, vector<1x64xf32>
    %4 = vector.broadcast %3 : vector<1x64xf32> to vector<16x64xf32>
    %5 = arith.addf %2, %4 : vector<16x64xf32>
    %6 = arith.negf %5 : vector<16x64xf32>
    %7 = math.exp %6 : vector<16x64xf32>
    %cst_5 = arith.constant 1.000000e+00 : f32
    %8 = vector.broadcast %cst_5 : f32 to vector<16x64xf32>
    %9 = arith.addf %8, %7 : vector<16x64xf32>
    %10 = arith.divf %8, %9 : vector<16x64xf32>
    %11 = arith.mulf %5, %10 : vector<16x64xf32>
    %c0_6 = arith.constant 0 : index
    %c0_7 = arith.constant 0 : index
    %12 = vector.load %arg4[%c0_6, %c0_7] : memref<64x32xf32, #tpu.memory_space<vmem>>, vector<64x32xf32>
    %cst_8 = arith.constant dense<0.000000e+00> : vector<16x32xf32>
    %13 = tpu.matmul %11, %12, %cst_8 {dimension_numbers = #tpu.dot_dimension_numbers<[1], [0], [0], [1], [0, 0, 1, 1], [], []>} : vector<16x64xf32>, vector<64x32xf32>, vector<16x32xf32> -> vector<16x32xf32>
    %c0_9 = arith.constant 0 : index
    %c0_10 = arith.constant 0 : index
    %14 = vector.load %arg5[%c0_9, %c0_10] : memref<1x32xf32, #tpu.memory_space<vmem>>, vector<1x32xf32>
    %15 = vector.broadcast %14 : vector<1x32xf32> to vector<16x32xf32>
    %16 = arith.addf %13, %15 : vector<16x32xf32>
    %c0_11 = arith.constant 0 : index
    %c0_12 = arith.constant 0 : index
    %17 = vector.load %arg6[%c0_11, %c0_12] : memref<16x32xf32, #tpu.memory_space<vmem>>, vector<16x32xf32>
    tpu.vector_store %arg6[%c0_11, %c0_12], %16 {strides = array<i32>} : memref<16x32xf32, #tpu.memory_space<vmem>>, vector<16x32xf32>,
    return
  }
  func.func @transform_0(%arg0: i32) -> (i32, i32) {
    %c0_i32 = arith.constant 0 : i32
    %c0_i32_0 = arith.constant 0 : i32
    return %arg0, %c0_i32 : i32, i32
  }
  func.func @transform_1(%arg0: i32) -> (i32, i32) {
    %c0_i32 = arith.constant 0 : i32
    %c0_i32_0 = arith.constant 0 : i32
    %c0_i32_1 = arith.constant 0 : i32
    return %c0_i32, %c0_i32_0 : i32, i32
  }
  func.func @transform_2(%arg0: i32) -> (i32, i32) {
    %c0_i32 = arith.constant 0 : i32
    %c0_i32_0 = arith.constant 0 : i32
    %c0_i32_1 = arith.constant 0 : i32
    return %c0_i32, %c0_i32_0 : i32, i32
  }
  func.func @transform_3(%arg0: i32) -> (i32, i32) {
    %c0_i32 = arith.constant 0 : i32
    %c0_i32_0 = arith.constant 0 : i32
    %c0_i32_1 = arith.constant 0 : i32
    return %c0_i32, %c0_i32_0 : i32, i32
  }
  func.func @transform_4(%arg0: i32) -> (i32, i32) {
    %c0_i32 = arith.constant 0 : i32
    %c0_i32_0 = arith.constant 0 : i32
    %c0_i32_1 = arith.constant 0 : i32
    return %c0_i32, %c0_i32_0 : i32, i32
  }
  func.func @transform_5(%arg0: i32) -> (i32, i32) {
    %c0_i32 = arith.constant 0 : i32
    %c0_i32_0 = arith.constant 0 : i32
    return %arg0, %c0_i32 : i32, i32
  }
}

</mosaic_0001>

<bundles_post_ra>
// kernel: position_wise_feed_forward.1
= control target key start
LH: loop header
LB: loop body
LE: loop exit
PB: predicated region body
PF: predicated region fallthrough
CT: control target
= control target key end

     0   :  { %vm34_vm0 = vcmask 261120   ;;  %s455_s0 = inlined_call_operand.vmem [shape: f32[16,32], index: 0, kind: input, shape index: {}]   ;;  %s456_s1 = inlined_call_operand.vmem [shape: f32[32,64], index: 1, kind: input, shape index: {}]   ;;  %s457_s2 = inlined_call_operand.vmem [shape: f32[1,64], index: 2, kind: input, shape index: {}]   ;;  %s458_s3 = inlined_call_operand.vmem [shape: f32[64,32], index: 3, kind: input, shape index: {}]   ;;  %s459_s4 = inlined_call_operand.vmem [shape: f32[1,32], index: 4, kind: input, shape index: {}]   ;;  %s460_s5 = inlined_call_operand.hbm [shape: f32[16,32], index: 5, kind: output, shape index: {}]  }
   0x1   :  { %v23_v0 = vld [vmem:[%s456_s1] sm:$0xff]  ;;  %v24_v1 = vld [vmem:[%s456_s1 + $0x8] sm:$0xff]  ;;  %v25_v2 = vld [vmem:[%s456_s1 + $0x10] sm:$0xff] }
   0x2   :  { %v299_v3 = vpack.c.bf16 %v24_v1, %v23_v0  ;;  %v26_v4 = vld [vmem:[%s456_s1 + $0x18] sm:$0xff]  ;;  %v21_v5 = vld [vmem:[%s455_s0] sm:$0xff] }
   0x3   :  { %v303_v6 = vpack.c.bf16 %v26_v4, %v25_v2  ;;  %277 = vmatprep.mubr.msk.f32.mxu0 %vm34_vm0, %v21_v5 }
   0x4   :  { %10 = vsyncpa [#allocation3], 0  ;;  %300 = vmatprep.subr.bf16.mxu0 %v299_v3  ;;  %v22_v7 = vld [vmem:[%s455_s0 + $0x8] sm:$0xff]  ;;  %v130_v8 = vld [vmem:[%s458_s3] sm:$0xff]  ;;  %vm145_vm1 = vcmask 523264   ;;  %s358_s21 = smov [#allocation2]  }
   0x5   :  { %302 = vmatpush3.bf16.msra.mxu0 %v299_v3  ;;  %v131_v9 = vld [vmem:[%s458_s3 + $0x8] sm:$0xff]  ;;  %v132_v11 = vld [vmem:[%s458_s3 + $0x10] sm:$0xff]  ;;  %v133_v12 = vld [vmem:[%s458_s3 + $0x18] sm:$0xff]  ;;  %s234_s22 = sshll.u32 %s358_s21, 4  ;;  %s235_s22 = int_to_ptr.vmem [resolvable:$true] %s234_s22 }
   0x6   :  { %304 = vmatprep.subr.bf16.mxu0 %v303_v6  ;;  %v307_v10 = vpack.c.bf16 %v131_v9, %v130_v8  ;;  %v311_v13 = vpack.c.bf16 %v133_v12, %v132_v11  ;;  %v134_v14 = vld [vmem:[%s458_s3 + $0x20] sm:$0xff]  ;;  %v135_v15 = vld [vmem:[%s458_s3 + $0x28] sm:$0xff]  ;;  %v136_v17 = vld [vmem:[%s458_s3 + $0x30] sm:$0xff]  ;;  %s334_s23 = scalar_lea.vmem %s235_s22, 256  ;;  %p339_p1 = scmp.lt.s32.totalorder %s235_s22, %s235_s22 }
   0x7   :  { %v315_v16 = vpack.c.bf16 %v135_v15, %v134_v14  ;;  %v137_v18 = vld [vmem:[%s458_s3 + $0x38] sm:$0xff]  ;;  %v245_v20 = vld [vmem:[%s457_s2] ss:$0 sm:$0xff]  ;;  %p335_p0 = scmp.ne.s32.totalorder %s235_s22, %s334_s23  ;;  %p340_p2 = scmp.lt.s32.totalorder %s334_s23, %s334_s23 }
   0x8   :  { %308 = vmatprep.subr.bf16.mxu1 %v307_v10  ;;  %v319_v19 = vpack.c.bf16 %v137_v18, %v136_v17  ;;  %v250_v35 = vld [vmem:[%s459_s4] ss:$0 sm:$0xff] }
   0x9   :  { %306 = vmatpush3.bf16.msra.mxu0 %v303_v6  ;;  %310 = vmatpush3.bf16.msra.mxu1 %v307_v10  ;;  %p341_p3 = por %p340_p2, %p339_p1 }
   0xa   :  { %312 = vmatprep.subr.bf16.mxu1 %v311_v13 }
   0xb   :  { %p342_p4 = pnand %p341_p3, %p335_p0 }
   0xc   :  { %278 = vmatmul.mubr.msk.f32.vlgmr.msra.gmra.mrb[0].mxu0 %vm34_vm0, %v22_v7 }
   0xd   :  { %314 = vmatpush3.bf16.msra.mxu1 %v311_v13 }
   0xe   :  { %316 = vmatprep.subr.bf16.mxu1 %v315_v16 }
  0x11   :  { %318 = vmatpush3.bf16.msra.mxu1 %v315_v16 }
  0x12   :  { %320 = vmatprep.subr.bf16.mxu1 %v319_v19 }
  0x15   :  { %322 = vmatpush3.bf16.msra.mxu1 %v319_v19 }
  0xdf   :  { %v279_v21 = vpop.f32.mrb[0].mxu0 }
  0xe0   :  { %v113_v22 = vadd.f32 %v279_v21, %v245_v20  ;;  %v107_v23 = vpop.f32.mrb[1].mxu0 }
  0xe1   :  { %v108_v24 = vadd.f32 %v245_v20, %v107_v23 }
  0xe2   :  { %v249_v25 = vmul.f32 -1.442695, %v113_v22 }
  0xe3   :  { %v248_v26 = vmul.f32 -1.442695, %v108_v24 }
  0xe4   :  { %326 = vpow2.f32 %v249_v25 }
  0xe5   :  { %328 = vpow2.f32 %v248_v26 }
  0xee   :  { %v327_v27 = vpop.eup %326 }
  0xef   :  { %v329_v28 = vpop.eup %328  ;;  %v123_v29 = vadd.f32 1.0, %v327_v27 }
  0xf0   :  { %v122_v30 = vadd.f32 1.0, %v329_v28 }
  0xf1   :  { %330 = vrcp.f32 %v123_v29 }
  0xf2   :  { %332 = vrcp.f32 %v122_v30 }
  0xfb   :  { %v331_v31 = vpop.eup %330 }
  0xfc   :  { %v333_v32 = vpop.eup %332  ;;  %v129_v34 = vmul.f32 %v331_v31, %v113_v22 }
  0xfd   :  { %v128_v33 = vmul.f32 %v333_v32, %v108_v24 }
  0xff   :  { %296 = vmatprep.mubr.msk.f32.mxu1 %vm145_vm1, %v128_v33 }
 0x100   :  { %297 = vmatmul.mubr.msk.f32.vlgmr.msra.gmra.mrb[0].mxu1 %vm145_vm1, %v129_v34 }
 0x1d3   :  { %v298_v36 = vpop.f32.mrb[0].mxu1 }
 0x1d4   :  { %v224_v37 = vadd.f32 %v298_v36, %v250_v35  ;;  %v218_v38 = vpop.f32.mrb[1].mxu1 }
 0x1d5   :  { %v219_v39 = vadd.f32 %v250_v35, %v218_v38 }
 0x1d6   :  { %228 = vst.msk [vmem:[#allocation2 + $0x8] sm:$0xff] %vm34_vm0, %v224_v37 }
 0x1d7   :  { %227 = vst.msk [vmem:[#allocation2] sm:$0xff] %vm34_vm0, %v219_v39 }
 0x1d8   :  { %345 = shalt.err (!%p342_p4)
}
 0x1d9   :  { %s346_s25 = scalar_lea.hbm %s460_s5, 256 }
 0x1da   :  { %p347_p5 = scmp.ne.s32.totalorder %s460_s5, %s346_s25  ;;  %p350_p6 = scmp.lt.u32.totalorder %s346_s25, %s460_s5 }
 0x1dc   :  { %p352_p7 = pnand %p350_p6, %p347_p5 }
 0x1de   :  { %355 = shalt.err (!%p352_p7)
}
 0x1df   :  { %s359_s30 = smov 128   ;;  %s360_s1 = smov 8  }
 0x1e0   :  { %240 = dma.vmem_to_hbm [thread:$0]  %s235_s22, 256, %s460_s5, [#allocation3], %s359_s30, %s359_s30, %s360_s1  }
 0x1e1   :  { %356 = dma.done.wait [#allocation3], 256  }
 0x1e2   :  { %357 = vsyncadd [#allocation3], 4294967040 }
 0x1e3   :  { %244 = vsyncpa [#allocation3], 1 }

</bundles_post_ra>
